<compile_context>
chip_gen: v5e
topology: v5e:2x2
jax: 0.10.0
libtpu: 0.0.40
codegen_flags: <defaults>
</compile_context>

<pallas_src>
import functools

import jax
import jax.numpy as jnp
from jax import lax
from jax.experimental import pallas as pl
from jax.experimental.pallas import tpu as pltpu


def _round_up(v: int, m: int) -> int:
    return ((v + m - 1) // m) * m


def _cdiv(a: int, b: int) -> int:
    return (a + b - 1) // b


def _sublane_multiple(dtype) -> int:
    # Minimum second-to-last-dim tile multiple per element width.
    return {4: 8, 2: 16, 1: 32}.get(jnp.dtype(dtype).itemsize, 8)


def _linear_kernel_single_k(x_ref, w_ref, b_ref, o_ref):
    # Single K step: no scratch accumulator, write the output tile directly.
    acc = lax.dot_general(
        x_ref[...],
        w_ref[...],
        dimension_numbers=(((1,), (1,)), ((), ())),
        preferred_element_type=jnp.float32,
    )
    o_ref[...] = (acc + b_ref[...].astype(jnp.float32)).astype(o_ref.dtype)


def _linear_kernel_multi_k(x_ref, w_ref, b_ref, o_ref, acc_ref):
    # x_ref:   (TM, TK)  activations tile
    # w_ref:   (TN, TK)  weight tile in PyTorch (out, in) layout
    # b_ref:   (1,  TN)  bias tile (resident per N tile)
    # o_ref:   (TM, TN)  output tile
    # acc_ref: (TM, TN)  f32 scratch accumulator, persistent across the K axis
    k = pl.program_id(2)

    partial = lax.dot_general(
        x_ref[...],
        w_ref[...],
        dimension_numbers=(((1,), (1,)), ((), ())),
        preferred_element_type=jnp.float32,
    )

    @pl.when(k == 0)
    def _():
        # Fold the bias into the first partial product: no zero-init store and
        # no read-modify-write on the first K step.
        acc_ref[...] = partial + b_ref[...].astype(jnp.float32)

    @pl.when(k > 0)
    def _():
        acc_ref[...] += partial

    @pl.when(k == pl.num_programs(2) - 1)
    def _():
        o_ref[...] = acc_ref[...].astype(o_ref.dtype)


@functools.partial(
    jax.jit,
    static_argnames=("tm", "tn", "tk", "min_parallel_tiles", "min_pallas_flops"),
)
def projection_head_forward(
    x,
    weight,
    bias,
    *,
    tm: int = 512,
    tn: int = 512,
    tk: int = 1024,
    min_parallel_tiles: int = 2,
    min_pallas_flops: int = 1 << 22,
):
    """y = x @ weight.T + bias  (semantics of nn.Linear forward).

    x:      (B, D_in)
    weight: (D_out, D_in)   -- PyTorch nn.Linear layout (NOT transposed)
    bias:   (D_out,)
    """
    B, D_in = x.shape
    D_out, D_in_w = weight.shape
    assert D_in_w == D_in, "weight feature dim must match x feature dim"
    out_dtype = x.dtype

    # Tiny-problem fallback: pallas_call fixed overhead + MXU padding dominate.
    if 2 * B * D_in * D_out < min_pallas_flops:
        y = jnp.dot(x, weight.T, preferred_element_type=jnp.float32)
        return (y + bias.astype(jnp.float32)).astype(out_dtype)

    esz_x = jnp.dtype(x.dtype).itemsize
    esz_w = jnp.dtype(weight.dtype).itemsize
    esz_b = jnp.dtype(bias.dtype).itemsize
    esz_o = jnp.dtype(out_dtype).itemsize

    sub_m = _sublane_multiple(x.dtype)

    # Tile caps kept layout-legal for any supported dtype.
    tm = _round_up(tm, max(sub_m, 8))
    tn = _round_up(tn, 128)
    tk = _round_up(tk, 128)

    # Full-dim tiles when the dim fits in one tile (always layout-legal, and
    # minimizes HBM re-reads of the other operand); otherwise aligned tiles
    # with a masked partial final block (no wrapper-side padding on M / N).
    TM = B if B <= tm else tm
    TN = D_out if D_out <= tn else tn
    TK = D_in if D_in <= tk else tk

    grid_m = _cdiv(B, TM)
    grid_n = _cdiv(D_out, TN)

    # Megacore (v7x dual TensorCore): make sure the parallel (M, N) grid has
    # at least 2 blocks for large batches, at the cost of one extra weight
    # read on single-core generations.  Set min_parallel_tiles=1 to disable.
    if (
        min_parallel_tiles >= 2
        and grid_m == 1
        and grid_n == 1
        and B >= 2 * sub_m
    ):
        TM = _round_up(_cdiv(B, 2), sub_m)
        grid_m = _cdiv(B, TM)

    grid_k = _cdiv(D_in, TK)
    Kp = grid_k * TK

    # Only the contraction dim genuinely requires zero padding (OOB K values
    # would otherwise contaminate valid outputs).  M / N partial blocks rely
    # on Pallas masked stores instead of extra HBM pad copies of x / weight.
    x_in = x if Kp == D_in else jnp.pad(x, ((0, 0), (0, Kp - D_in)))
    w_in = weight if Kp == D_in else jnp.pad(weight, ((0, 0), (0, Kp - D_in)))
    b_in = bias.reshape(1, D_out)

    # VMEM budget: double-buffered x / w / out tiles (+ bias) + accumulator.
    vmem_est = (
        2 * TM * TK * esz_x
        + 2 * TN * TK * esz_w
        + 2 * TM * TN * esz_o
        + 2 * TN * esz_b
    )
    if grid_k > 1:
        vmem_est += TM * TN * 4
    vmem_limit = int(min(max(2 * vmem_est, 32 << 20), 48 << 20))

    # Advisory cost estimate from tiled sizes x grid re-read factors.
    cost = pl.CostEstimate(
        flops=int(2 * (grid_m * TM) * (grid_n * TN) * (grid_k * TK)),
        transcendentals=0,
        bytes_accessed=int(
            grid_n * B * Kp * esz_x        # x re-read once per N tile
            + grid_m * D_out * Kp * esz_w  # weight re-read once per M tile
            + D_out * esz_b
            + B * D_out * esz_o
        ),
    )

    if grid_k == 1:
        out = pl.pallas_call(
            _linear_kernel_single_k,
            out_shape=jax.ShapeDtypeStruct((B, D_out), out_dtype),
            grid_spec=pl.GridSpec(
                grid=(grid_m, grid_n),
                in_specs=[
                    pl.BlockSpec((TM, TK), lambda i, j: (i, 0)),  # x tile
                    pl.BlockSpec((TN, TK), lambda i, j: (j, 0)),  # weight tile
                    pl.BlockSpec((1, TN), lambda i, j: (0, j)),   # bias tile
                ],
                out_specs=pl.BlockSpec((TM, TN), lambda i, j: (i, j)),
            ),
            compiler_params=pltpu.CompilerParams(
                dimension_semantics=("parallel", "parallel"),
                vmem_limit_bytes=vmem_limit,
            ),
            cost_estimate=cost,
        )(x_in, w_in, b_in)
    else:
        out = pl.pallas_call(
            _linear_kernel_multi_k,
            out_shape=jax.ShapeDtypeStruct((B, D_out), out_dtype),
            grid_spec=pl.GridSpec(
                grid=(grid_m, grid_n, grid_k),
                in_specs=[
                    pl.BlockSpec((TM, TK), lambda i, j, k: (i, k)),  # x tile
                    pl.BlockSpec((TN, TK), lambda i, j, k: (j, k)),  # weight tile
                    pl.BlockSpec((1, TN), lambda i, j, k: (0, j)),   # bias tile
                ],
                out_specs=pl.BlockSpec((TM, TN), lambda i, j, k: (i, j)),
                scratch_shapes=[pltpu.VMEM((TM, TN), jnp.float32)],
            ),
            compiler_params=pltpu.CompilerParams(
                dimension_semantics=("parallel", "parallel", "arbitrary"),
                vmem_limit_bytes=vmem_limit,
            ),
            cost_estimate=cost,
        )(x_in, w_in, b_in)

    return out


if __name__ == "__main__":
    # Small shapes consistent with the module's forward: (batch, input_dim).
    batch, input_dim, output_dim = 8, 32, 16

    key = jax.random.PRNGKey(0)
    kx, kw, kb = jax.random.split(key, 3)

    # Deterministic parameter init mirroring nn.Linear's default
    # U(-1/sqrt(in), 1/sqrt(in)) for both weight and bias.
    bound = 1.0 / (input_dim ** 0.5)
    weight = jax.random.uniform(
        kw, (output_dim, input_dim), jnp.float32, minval=-bound, maxval=bound
    )
    bias = jax.random.uniform(
        kb, (output_dim,), jnp.float32, minval=-bound, maxval=bound
    )
    x = jax.random.normal(kx, (batch, input_dim), jnp.float32)
    y_ref = x @ weight.T + bias

    # Force the Pallas path at the module's tiny shape (single full-dim tile,
    # single-K kernel).
    y = jax.block_until_ready(
        projection_head_forward(x, weight, bias, min_pallas_flops=0)
    )
    assert y.shape == (batch, output_dim)
    assert jnp.allclose(y, y_ref, atol=1e-5, rtol=1e-5)

    # Default path at the same tiny shape takes the plain-XLA fallback.
    y_fb = jax.block_until_ready(projection_head_forward(x, weight, bias))
    assert jnp.allclose(y_fb, y_ref, atol=1e-5, rtol=1e-5)

    # Larger, tile-aligned problem: exercises the megacore split (2 parallel
    # M tiles) and the single-K direct-store kernel.
    B2, Din2, Dout2 = 512, 1024, 256
    k1, k2, k3 = jax.random.split(jax.random.PRNGKey(1), 3)
    x2 = jax.random.normal(k1, (B2, Din2), jnp.float32)
    w2 = jax.random.normal(k2, (Dout2, Din2), jnp.float32) * 0.02
    b2 = jax.random.normal(k3, (Dout2,), jnp.float32) * 0.02
    y2 = jax.block_until_ready(projection_head_forward(x2, w2, b2))
    y2_ref = x2 @ w2.T + b2
    assert y2.shape == (B2, Dout2)
    assert jnp.allclose(y2, y2_ref, atol=2e-2, rtol=2e-2)

    # Ragged problem: partial final M block (masked stores), K zero-padded to
    # the tile multiple, multi-K accumulator kernel with bias folded at k==0.
    B3, Din3, Dout3 = 1000, 1300, 200
    k4, k5, k6 = jax.random.split(jax.random.PRNGKey(2), 3)
    x3 = jax.random.normal(k4, (B3, Din3), jnp.float32)
    w3 = jax.random.normal(k5, (Dout3, Din3), jnp.float32) * 0.02
    b3 = jax.random.normal(k6, (Dout3,), jnp.float32) * 0.02
    y3 = jax.block_until_ready(projection_head_forward(x3, w3, b3))
    y3_ref = x3 @ w3.T + b3
    assert y3.shape == (B3, Dout3)
    assert jnp.allclose(y3, y3_ref, atol=2e-2, rtol=2e-2)

    print("KERNEL_OK")
</pallas_src>

<mosaic_0001>
module attributes {stable_mosaic.version = 11 : i64} {
  func.func @_linear_kernel_single_k(%arg0: i32, %arg1: i32, %arg2: memref<8x32xf32, #tpu.memory_space<vmem>>, %arg3: memref<16x32xf32, #tpu.memory_space<vmem>>, %arg4: memref<1x16xf32, #tpu.memory_space<vmem>>, %arg5: memref<8x16xf32, #tpu.memory_space<vmem>>) attributes {dimension_semantics = [#tpu.dimension_semantics<parallel>, #tpu.dimension_semantics<parallel>], iteration_bounds = array<i64: 1, 1>, scalar_prefetch = 0 : i64, scratch_operands = 0 : i64, tpu.core_type = #tpu.core_type<tc>, window_params = [{transform_indices = @transform_0, window_bounds = array<i64: 8, 32>}, {transform_indices = @transform_1, window_bounds = array<i64: 16, 32>}, {transform_indices = @transform_2, window_bounds = array<i64: 1, 16>}, {transform_indices = @transform_3, window_bounds = array<i64: 8, 16>}]} {
    %c0 = arith.constant 0 : index
    %c0_0 = arith.constant 0 : index
    %0 = vector.load %arg2[%c0, %c0_0] : memref<8x32xf32, #tpu.memory_space<vmem>>, vector<8x32xf32>
    %c0_1 = arith.constant 0 : index
    %c0_2 = arith.constant 0 : index
    %1 = vector.load %arg3[%c0_1, %c0_2] : memref<16x32xf32, #tpu.memory_space<vmem>>, vector<16x32xf32>
    %cst = arith.constant dense<0.000000e+00> : vector<8x16xf32>
    %2 = tpu.matmul %0, %1, %cst {dimension_numbers = #tpu.dot_dimension_numbers<[1], [1], [0], [0], [0, 0, 1, 0], [], []>} : vector<8x32xf32>, vector<16x32xf32>, vector<8x16xf32> -> vector<8x16xf32>
    %c0_3 = arith.constant 0 : index
    %c0_4 = arith.constant 0 : index
    %3 = vector.load %arg4[%c0_3, %c0_4] : memref<1x16xf32, #tpu.memory_space<vmem>>, vector<1x16xf32>
    %4 = vector.broadcast %3 : vector<1x16xf32> to vector<8x16xf32>
    %5 = arith.addf %2, %4 : vector<8x16xf32>
    %c0_5 = arith.constant 0 : index
    %c0_6 = arith.constant 0 : index
    %6 = vector.load %arg5[%c0_5, %c0_6] : memref<8x16xf32, #tpu.memory_space<vmem>>, vector<8x16xf32>
    tpu.vector_store %arg5[%c0_5, %c0_6], %5 {strides = array<i32>} : memref<8x16xf32, #tpu.memory_space<vmem>>, vector<8x16xf32>,
    return
  }
  func.func @transform_0(%arg0: i32, %arg1: i32) -> (i32, i32) {
    %c0_i32 = arith.constant 0 : i32
    %c0_i32_0 = arith.constant 0 : i32
    return %arg0, %c0_i32 : i32, i32
  }
  func.func @transform_1(%arg0: i32, %arg1: i32) -> (i32, i32) {
    %c0_i32 = arith.constant 0 : i32
    %c0_i32_0 = arith.constant 0 : i32
    return %arg1, %c0_i32 : i32, i32
  }
  func.func @transform_2(%arg0: i32, %arg1: i32) -> (i32, i32) {
    %c0_i32 = arith.constant 0 : i32
    %c0_i32_0 = arith.constant 0 : i32
    return %c0_i32, %arg1 : i32, i32
  }
  func.func @transform_3(%arg0: i32, %arg1: i32) -> (i32, i32) {
    %c0_i32 = arith.constant 0 : i32
    return %arg0, %arg1 : i32, i32
  }
}

</mosaic_0001>

<bundles_post_ra>
// kernel: projection_head_forward.1
= control target key start
LH: loop header
LB: loop body
LE: loop exit
PB: predicated region body
PF: predicated region fallthrough
CT: control target
= control target key end

     0   :  { %8 = vsyncpa [#allocation3], 0  ;;  %s226_s0 = inlined_call_operand.hbm [shape: f32[8,32], index: 0, kind: input, shape index: {}]   ;;  %s227_s1 = inlined_call_operand.hbm [shape: f32[16,32], index: 1, kind: input, shape index: {}]   ;;  %s228_s2 = inlined_call_operand.vmem [shape: f32[1,16], index: 2, kind: input, shape index: {}]   ;;  %s229_s3 = inlined_call_operand.hbm [shape: f32[8,16], index: 3, kind: output, shape index: {}]  }
   0x1   :  { %9 = vsyncpa [#allocation6], 0 }
   0x2   :  { %10 = vsyncpa [#allocation4], 0  ;;  %s16_s14 = sshll.u32 %s226_s0, 4  ;;  %s189_s15 = smov [#allocation2]   ;;  %s17_s14 = int_to_ptr.hbm [resolvable:$true] %s16_s14 }
   0x3   :  { %s18_s16 = sshll.u32 %s189_s15, 4  ;;  %s26_s19 = sshll.u32 %s227_s1, 4  ;;  %s19_s16 = int_to_ptr.vmem [resolvable:$true] %s18_s16  ;;  %s27_s19 = int_to_ptr.hbm [resolvable:$true] %s26_s19 }
   0x4   :  { %21 = dma.hbm_to_vmem [thread:$0]  %s17_s14, 128, %s19_s16, [#allocation3]  }
   0x5   :  { %s190_s20 = smov [#allocation5]   ;;  %s191_s22 = smov 128  }
   0x6   :  { %s28_s21 = sshll.u32 %s190_s20, 4  ;;  %s192_s23 = smov 8   ;;  %s29_s21 = int_to_ptr.vmem [resolvable:$true] %s28_s21 }
   0x7   :  { %34 = dma.hbm_to_vmem [thread:$0]  %s27_s19, 256, %s29_s21, [#allocation6], %s191_s22, %s191_s22, %s192_s23  }
   0x8   :  { %183 = dma.done.wait [#allocation3], 128  }
   0x9   :  { %184 = vsyncadd [#allocation3], 4294967168 }
   0xa   :  { %185 = dma.done.wait [#allocation6], 256  }
   0xb   :  { %186 = vsyncadd [#allocation6], 4294967040  ;;  %vm52_vm0 = vcmask 261120   ;;  %v47_v0 = vld [vmem:[#allocation5 + $0x8] sm:$0xff]  ;;  %v46_v1 = vld [vmem:[#allocation5] sm:$0xff]  ;;  %s193_s24 = smov [#allocation7]  }
   0xc   :  { %102 = vmatpush.xpose.msk.msra.mxu0 %vm52_vm0, %v47_v0  ;;  %v45_v2 = vld [vmem:[#allocation2] sm:$0xff]  ;;  %s89_s25 = sshll.u32 %s193_s24, 4  ;;  %s91_s28 = sshll.u32 %s229_s3, 4  ;;  %vm82_vm1 = vcmask 130048   ;;  %s90_s25 = int_to_ptr.vmem [resolvable:$true] %s89_s25  ;;  %s92_s28 = int_to_ptr.hbm [resolvable:$true] %s91_s28 }
   0xd   :  { %v110_v3 = vld [vmem:[%s228_s2] ss:$0 sm:$0xff] }
  0x10   :  { %103 = vmatpush.xpose.msk.msra.mxu0 %vm52_vm0, %v46_v1 }
  0x13   :  { %104 = vmatmul.msk.f32.vlgmr.msra.gmra.mxu0 %vm52_vm0, %v45_v2 }
  0x90   :  { %v79_v4 = vpop.f32.mrf.mxu0 }
  0x91   :  { %v80_v5 = vadd.f32 %v110_v3, %v79_v4 }
  0x93   :  { %83 = vst.msk [vmem:[#allocation7] sm:$0xff] %vm82_vm1, %v80_v5 }
  0x94   :  { %94 = dma.vmem_to_hbm [thread:$0]  %s90_s25, 128, %s92_s28, [#allocation4]  }
  0x95   :  { %187 = dma.done.wait [#allocation4], 128  }
  0x96   :  { %188 = vsyncadd [#allocation4], 4294967168 }
  0x97   :  { %99 = vsyncpa [#allocation3], 1 }
  0x98   :  { %100 = vsyncpa [#allocation6], 1 }
  0x99   :  { %101 = vsyncpa [#allocation4], 1 }

</bundles_post_ra>
